<compile_context>
chip_gen: v7x
topology: tpu7x:2x2x1
jax: 0.10.0
libtpu: 0.0.40
codegen_flags: <defaults>
</compile_context>

<pallas_src>
import math

import jax
import jax.numpy as jnp
from jax.experimental import pallas as pl
from jax.experimental.pallas import tpu as pltpu


# ---------------------------------------------------------------------------
# Path 1 (default): zero-copy flatten via input/output aliasing.
# ---------------------------------------------------------------------------
def _aliased_flatten_kernel(x_hbm_ref, o_hbm_ref, flag_ref):
    # The output HBM buffer aliases the input buffer (input_output_aliases),
    # and the row-major flatten is a free reshape done in the wrapper, so the
    # flattened data already lives in the output buffer.  Nothing to move:
    # no DMA, no VMEM round trip, no vector work.
    del x_hbm_ref, o_hbm_ref
    flag_ref[0] = jnp.int32(1)  # keep the lowered kernel body non-empty


def radiomics_extractor_forward(x: jax.Array) -> jax.Array:
    """Equivalent of RadiomicsExtractor.forward for the implementable part.

    x: (B, C, H, W) array (NCHW, matching the PyTorch module's input).
    returns: (B, C*H*W) — the `x.view(x.size(0), -1)` result.

    The output aliases the input buffer; inside a larger jit (or with the
    argument donated) this is a true zero-copy no-op.  Called eagerly, XLA
    inserts at most one device-side copy to preserve the caller's array.
    """
    B = x.shape[0]
    flat = math.prod(x.shape[1:])

    # Row-major flatten is a metadata-only view in XLA; done outside the
    # kernel so the kernel never has to touch the data.
    x2d = x.reshape(B, flat)

    return pl.pallas_call(
        _aliased_flatten_kernel,
        out_shape=jax.ShapeDtypeStruct((B, flat), x.dtype),
        in_specs=[pl.BlockSpec(memory_space=pl.ANY)],
        out_specs=pl.BlockSpec(memory_space=pl.ANY),
        scratch_shapes=[pltpu.SMEM((1,), jnp.int32)],
        input_output_aliases={0: 0},
    )(x2d)


# ---------------------------------------------------------------------------
# Path 2: if a distinct materialized output buffer is required, do a single
# direct HBM->HBM DMA (no VMEM round trip, no tiling, no grid overhead).
# ---------------------------------------------------------------------------
def _dma_flatten_copy_kernel(x_hbm_ref, o_hbm_ref, sem):
    cp = pltpu.make_async_copy(x_hbm_ref, o_hbm_ref, sem)
    cp.start()
    cp.wait()


def radiomics_extractor_forward_copy(x: jax.Array) -> jax.Array:
    """Same semantics, but always writes a fresh output buffer (one DMA)."""
    B = x.shape[0]
    flat = math.prod(x.shape[1:])
    x2d = x.reshape(B, flat)

    return pl.pallas_call(
        _dma_flatten_copy_kernel,
        out_shape=jax.ShapeDtypeStruct((B, flat), x.dtype),
        in_specs=[pl.BlockSpec(memory_space=pl.ANY)],
        out_specs=pl.BlockSpec(memory_space=pl.ANY),
        scratch_shapes=[pltpu.SemaphoreType.DMA],
        cost_estimate=pl.CostEstimate(
            flops=0,
            transcendentals=0,
            bytes_accessed=2 * B * flat * x.dtype.itemsize,
        ),
    )(x2d)


if __name__ == "__main__":
    key = jax.random.PRNGKey(0)
    # Small shapes consistent with the module's forward (NCHW image batch).
    B, C, H, W = 2, 4, 16, 16
    x = jax.random.normal(key, (B, C, H, W), dtype=jnp.float32)

    # Pure-JAX reference of the flatten.
    ref = x.reshape(B, -1)

    # Default (aliased, zero-copy) path.
    out = jax.block_until_ready(radiomics_extractor_forward(x))
    assert out.shape == (B, C * H * W), out.shape
    assert out.dtype == jnp.float32, out.dtype
    assert bool(jnp.all(out == ref)), "aliased flatten mismatch vs reference"

    # Materialized-copy (HBM->HBM DMA) path.
    out_copy = jax.block_until_ready(radiomics_extractor_forward_copy(x))
    assert out_copy.shape == (B, C * H * W), out_copy.shape
    assert bool(jnp.all(out_copy == ref)), "DMA-copy flatten mismatch vs reference"

    print("KERNEL_OK")
</pallas_src>

<mosaic_0001>
module attributes {stable_mosaic.version = 11 : i64} {
  func.func @_aliased_flatten_kernel(%arg0: memref<2x1024xf32, #tpu.memory_space<any>>, %arg1: memref<2x1024xf32, #tpu.memory_space<any>>, %arg2: memref<1xi32, #tpu.memory_space<smem>>) attributes {dimension_semantics = [], scalar_prefetch = 0 : i64, scratch_operands = 1 : i64, tpu.core_type = #tpu.core_type<tc>} {
    %c1_i32 = arith.constant 1 : i32
    %c0 = arith.constant 0 : index
    %0 = memref.load %arg2[%c0] : memref<1xi32, #tpu.memory_space<smem>>
    memref.store %c1_i32, %arg2[%c0] : memref<1xi32, #tpu.memory_space<smem>>
    return
  }
}

</mosaic_0001>

<bundles_post_ra>
// kernel: tpu_custom_call.1
= control target key start
LH: loop header
LB: loop body
LE: loop exit
PB: predicated region body
PF: predicated region fallthrough
CT: control target
= control target key end

     0   :  { %s18_s0 = inlined_call_operand.hbm [shape: f32[2,1024], index: 0, kind: input, shape index: {}, may-alias: {0,1}]   ;;  %s19_s1 = inlined_call_operand.hbm [shape: f32[2,1024], index: 1, kind: output, shape index: {}, may-alias: {0,1}]  }

</bundles_post_ra>
